<compile_context>
chip_gen: v6e
topology: v6e:2x2x1
jax: 0.10.0
libtpu: 0.0.40
codegen_flags: <defaults>
</compile_context>

<pallas_src>
import functools
import math

import numpy as np
import jax
import jax.numpy as jnp
from jax.experimental import pallas as pl
from jax.experimental.pallas import tpu as pltpu


# ----------------------------------------------------------------------------
# Static geometry (shared by init and forward so packed layouts agree)
# ----------------------------------------------------------------------------
def _round_up(x, m):
    return (x + m - 1) // m * m


def _pick_divisor(n, candidates):
    for c in candidates:
        if n % c == 0:
            return c
    return n


def _pick_m_tile(m_raw):
    """Largest multiple-of-8 divisor of m_raw that is <= 256; fall back to a
    256-row tile with tail padding if no divisor >= 128 exists."""
    best = 8
    for t in range(8, min(m_raw, 256) + 1, 8):
        if m_raw % t == 0:
            best = t
    if best >= 128 or m_raw <= 256:
        return best, m_raw
    return 256, _round_up(m_raw, 256)


def _vmem_limit_bytes(default=48 * 1024 * 1024):
    """~3/4 of physical VMEM: ~48 MiB on v7x (64 MiB), ~96 MiB on v5e/v6e (128 MiB)."""
    try:
        info = pltpu.get_tpu_info()
        cap = getattr(info, "vmem_capacity_bytes", None)
        if cap:
            return int(cap) * 3 // 4
    except Exception:
        pass
    return default


def spectro_geometry(n_points, hop_length, n_mels, n_classes):
    n_fft = 2 * n_points                               # -> n_points + 1 freq bins
    n_freq = n_fft // 2 + 1
    n_time = n_points // hop_length + 1                # centered STFT frame count
    NF = _round_up(n_freq, 128)                        # lane-padded freq bins
    NFT = _pick_divisor(NF, (512, 256, 128))           # freq tile (VMEM-bounded)
    KP = _round_up(n_fft, 128)                         # lane-padded frame length
    TK = _pick_divisor(KP, (1024, 512, 256, 128))      # DFT matmul K tile
    MELP = _round_up(n_mels, 128)                      # lane-padded mel bins
    TP = _round_up(n_time, 8)                          # time padded to sublanes only
    CP = _round_up(n_classes, 128)                     # lane-padded class logits
    D_in = n_time * n_mels                             # compact MLP input features
    D_c = _round_up(D_in, 128)
    TKD = min(16384, D_c)                              # fc1 K tile
    D_pad2 = _round_up(D_in, TKD)
    return dict(n_fft=n_fft, n_freq=n_freq, n_time=n_time, NF=NF, NFT=NFT, KP=KP,
                TK=TK, MELP=MELP, TP=TP, CP=CP, D_in=D_in, TKD=TKD, D_pad2=D_pad2)


# ----------------------------------------------------------------------------
# Pallas kernels
# ----------------------------------------------------------------------------
def _melspec_kernel(frames_ref, win_ref, basis_ref, melfb_ref, out_ref,
                    dft_acc_ref, mel_acc_ref, *, energy_normalize):
    # frames_ref : (TM, TK)     bf16  tile of zero-padded (M_pad, KP) frames
    # win_ref    : (1, TK)      bf16  Gaussian window slab (learnable lambd)
    # basis_ref  : (TK, 2*NFT)  bf16  static [cos | sin] DFT basis block
    # melfb_ref  : (NFT, MELP)  bf16  mel filterbank rows for this freq block
    # out_ref    : (TM, MELP)   f32   mel spectrogram tile (time rows, mel lanes)
    # dft_acc_ref: (TM, 2*NFT)  f32   re|im accumulator over K blocks
    # mel_acc_ref: (TM, MELP)   f32   mel accumulator over freq blocks
    nf = pl.program_id(1)
    k = pl.program_id(2)

    @pl.when(jnp.logical_and(nf == 0, k == 0))
    def _init_mel():
        mel_acc_ref[...] = jnp.zeros_like(mel_acc_ref)

    @pl.when(k == 0)
    def _init_dft():
        dft_acc_ref[...] = jnp.zeros_like(dft_acc_ref)

    fr = frames_ref[...] * win_ref[...]                      # VPU, hidden under MXU
    dft_acc_ref[...] += jnp.dot(fr, basis_ref[...],
                                preferred_element_type=jnp.float32)

    @pl.when(k == pl.num_programs(2) - 1)
    def _accum_mel():
        nft = melfb_ref.shape[0]
        re = dft_acc_ref[:, :nft]
        im = dft_acc_ref[:, nft:]
        power = (re * re + im * im).astype(jnp.bfloat16)     # |STFT|^2, this freq tile
        mel_acc_ref[...] += jnp.dot(power, melfb_ref[...],
                                    preferred_element_type=jnp.float32)

    @pl.when(jnp.logical_and(k == pl.num_programs(2) - 1,
                             nf == pl.num_programs(1) - 1))
    def _finalize():
        mel = mel_acc_ref[...]
        if energy_normalize:
            mel = jnp.log1p(mel)                             # log(mel + 1)
        out_ref[...] = mel


def _mlp_kernel(x_ref, w1_ref, b1_ref, w2_ref, out_ref, acc_ref):
    # x_ref  : (B_pad, TKD)   bf16  K-slab of the compacted (time*mel) features
    # w1_ref : (1, TKD, H2)   bf16  matching K-slab of this core's fc1 column half
    # b1_ref : (1, 1, H2)     f32
    # w2_ref : (1, H2, CP)    f32   fc2 rows for this hidden half (classes padded)
    # out_ref: (1, B_pad, CP) f32   partial logits for this hidden half
    # acc_ref: (B_pad, H2)    f32   fc1 accumulator over K blocks
    k = pl.program_id(1)

    @pl.when(k == 0)
    def _init():
        acc_ref[...] = jnp.zeros_like(acc_ref)

    acc_ref[...] += jnp.dot(x_ref[...], w1_ref[0],
                            preferred_element_type=jnp.float32)

    @pl.when(k == pl.num_programs(1) - 1)
    def _finalize():
        h = jnp.maximum(acc_ref[...] + b1_ref[0], 0.0)       # fc1 + ReLU
        # TODO(synk): F.dropout(p=0.2) is stochastic train-time masking; identity here.
        out_ref[0] = jnp.dot(h, w2_ref[0], preferred_element_type=jnp.float32)


# ----------------------------------------------------------------------------
# Host-side constant construction (built once, reused every forward)
# ----------------------------------------------------------------------------
def _mel_filterbank_np(n_freq, f_min, f_max, n_mels, sample_rate):
    # torchaudio.functional.melscale_fbanks defaults: HTK scale, norm=None.
    all_freqs = np.linspace(0.0, float(sample_rate // 2), n_freq)
    hz_to_mel = lambda f: 2595.0 * np.log10(1.0 + f / 700.0)
    m_pts = np.linspace(hz_to_mel(f_min), hz_to_mel(f_max), n_mels + 2)
    f_pts = 700.0 * (10.0 ** (m_pts / 2595.0) - 1.0)
    f_diff = f_pts[1:] - f_pts[:-1]
    slopes = f_pts[None, :] - all_freqs[:, None]             # (n_freq, n_mels + 2)
    down = -slopes[:, :-2] / f_diff[:-1]
    up = slopes[:, 2:] / f_diff[1:]
    return np.maximum(0.0, np.minimum(down, up)).astype(np.float32)


def _dft_basis_np(n_fft, n_freq, KP, NF, NFT):
    # Exact integer phase in int64: no overflow even for n_fft >= 131072.
    m = np.arange(n_fft, dtype=np.int64)[:, None]
    f = np.arange(n_freq, dtype=np.int64)[None, :]
    ang = ((m * f) % n_fft).astype(np.float64) * (2.0 * np.pi / n_fft)
    cosp = np.zeros((KP, NF), np.float32)
    sinp = np.zeros((KP, NF), np.float32)
    cosp[:n_fft, :n_freq] = np.cos(ang)
    sinp[:n_fft, :n_freq] = np.sin(ang)
    # Interleave per NF tile: block j holds [cos_j | sin_j] so the kernel's
    # (TK, 2*NFT) BlockSpec picks a matched cos/sin pair for each freq tile.
    nt = NF // NFT
    basis = np.concatenate([cosp.reshape(KP, nt, NFT),
                            sinp.reshape(KP, nt, NFT)], axis=2)
    return basis.reshape(KP, 2 * NF)


# ----------------------------------------------------------------------------
# Parameter packing (nn.Linear default init, packed once for the kernels)
# ----------------------------------------------------------------------------
def pack_mlp_params(w1, b1, w2, b2, *, n_mels, n_time, D_pad2, CP):
    """Convert PyTorch-layout fc weights to the kernels' packed layout.

    w1: (n_mels*n_time, hidden), rows in PyTorch flatten order (mel*n_time + t)
    -> w1p: (NSPLIT, D_pad2, hidden//NSPLIT) bf16, rows in the kernels' compact
            order (t*n_mels + mel), columns split into NSPLIT halves (one per core).
    """
    w1 = np.asarray(w1, np.float32)
    b1 = np.asarray(b1, np.float32)
    w2 = np.asarray(w2, np.float32)
    b2 = np.asarray(b2, np.float32)
    hidden = w1.shape[1]
    n_classes = w2.shape[1]
    nsplit = 2 if hidden % 2 == 0 else 1
    h2 = hidden // nsplit
    d_in = n_mels * n_time

    w1_tm = w1.reshape(n_mels, n_time, hidden).transpose(1, 0, 2).reshape(d_in, hidden)
    w1_pad = np.zeros((D_pad2, hidden), np.float32)
    w1_pad[:d_in] = w1_tm
    w1p = w1_pad.reshape(D_pad2, nsplit, h2).transpose(1, 0, 2)   # (NSPLIT, D_pad2, H2)
    b1p = b1.reshape(nsplit, 1, h2)
    w2_pad = np.zeros((hidden, CP), np.float32)
    w2_pad[:, :n_classes] = w2
    w2p = w2_pad.reshape(nsplit, h2, CP)
    b2p = np.zeros((1, CP), np.float32)
    b2p[0, :n_classes] = b2
    return {"w1p": jnp.asarray(w1p, jnp.bfloat16),
            "b1p": jnp.asarray(b1p, jnp.float32),
            "w2p": jnp.asarray(w2p, jnp.float32),
            "b2p": jnp.asarray(b2p, jnp.float32)}


def init_params(key, *, n_points, hop_length, n_mels, n_classes, hidden,
                init_lambd, sample_rate, f_min=0.0, f_max=None):
    g = spectro_geometry(n_points, hop_length, n_mels, n_classes)
    n_time = g["n_time"]
    d_in = n_mels * n_time
    k1, k2, k3, k4 = jax.random.split(key, 4)
    lim1 = 1.0 / math.sqrt(d_in)
    lim2 = 1.0 / math.sqrt(hidden)
    # stored transposed vs PyTorch ((in, out)) so the kernels compute x @ w
    w1 = jax.random.uniform(k1, (d_in, hidden), jnp.float32, -lim1, lim1)
    b1 = jax.random.uniform(k2, (hidden,), jnp.float32, -lim1, lim1)
    w2 = jax.random.uniform(k3, (hidden, n_classes), jnp.float32, -lim2, lim2)
    b2 = jax.random.uniform(k4, (n_classes,), jnp.float32, -lim2, lim2)

    params = {"lambd": jnp.float32(init_lambd)}
    params.update(pack_mlp_params(w1, b1, w2, b2, n_mels=n_mels, n_time=n_time,
                                  D_pad2=g["D_pad2"], CP=g["CP"]))

    # lambd-independent constants: built once on the host, never rebuilt per call.
    f_max_v = float(sample_rate // 2) if f_max is None else float(f_max)
    fb = _mel_filterbank_np(g["n_freq"], f_min, f_max_v, n_mels, sample_rate)
    melfb = np.zeros((g["NF"], g["MELP"]), np.float32)
    melfb[:g["n_freq"], :n_mels] = fb
    basis = _dft_basis_np(g["n_fft"], g["n_freq"], g["KP"], g["NF"], g["NFT"])
    params["melfb"] = jnp.asarray(melfb, jnp.bfloat16)
    params["basis"] = jnp.asarray(basis, jnp.bfloat16)
    return params


# ----------------------------------------------------------------------------
# Forward (wrapper glue outside the hot loops is plain JAX)
# ----------------------------------------------------------------------------
def melmlpnet_forward(x, params, *, n_mels, n_classes, hop_length=1,
                      normalize_window=False, energy_normalize=False):
    B, n_points = x.shape
    g = spectro_geometry(n_points, hop_length, n_mels, n_classes)
    n_fft, n_time = g["n_fft"], g["n_time"]
    NF, NFT, KP, TK = g["NF"], g["NFT"], g["KP"], g["TK"]
    MELP, TP, CP = g["MELP"], g["TP"], g["CP"]
    D_in, TKD = g["D_in"], g["TKD"]
    TM, M_pad = _pick_m_tile(B * TP)
    vmem_limit = _vmem_limit_bytes()

    NSPLIT, D_pad2, H2 = params["w1p"].shape
    assert D_pad2 == g["D_pad2"] and D_pad2 % TKD == 0

    # ---- mean removal, zero center padding, framing --------------------------
    x0 = x - jnp.mean(x, axis=1, keepdims=True)               # x[idx] - mean(x[idx])
    pad = n_fft // 2
    # TODO(synk): padding mode of tf.differentiable_spectrogram is unavailable;
    # constant (zero) center padding assumed (reflect padding would change edge frames).
    xpad = jnp.pad(x0, ((0, 0), (pad, pad)))
    idx = (jnp.arange(n_time) * hop_length)[:, None] + jnp.arange(n_fft)[None, :]
    # TODO(synk): with hop_length=1 this wrapper gather still costs O(B*n_time*n_fft)
    # HBM; in-kernel Hankel framing (pl.ANY + strided pltpu.roll) would reduce it to
    # O(B*n_points) but needs lane-dim dynamic slicing -- deferred for robustness.
    frames = xpad[:, idx]                                     # (B, n_time, n_fft)
    frames = jnp.pad(frames, ((0, 0), (0, TP - n_time), (0, KP - n_fft)))
    frames = frames.reshape(B * TP, KP)
    frames = jnp.pad(frames, ((0, M_pad - B * TP), (0, 0))).astype(jnp.bfloat16)

    # ---- per-call Gaussian window from learnable lambd (basis stays static) --
    sigma = jnp.abs(params["lambd"])                          # torch.abs(self.lambd)
    m = jnp.arange(n_fft, dtype=jnp.float32) - float(n_fft // 2)
    window = jnp.exp(-0.5 * jnp.square(m / sigma))
    if normalize_window:
        window = window / jnp.sum(window)
    win = jnp.zeros((1, KP), jnp.float32).at[0, :n_fft].set(window)
    win = win.astype(jnp.bfloat16)

    # ---- kernel 1: (window*frames) -> [cos|sin] DFT -> power -> mel ----------
    mel_flat = pl.pallas_call(
        functools.partial(_melspec_kernel, energy_normalize=energy_normalize),
        out_shape=jax.ShapeDtypeStruct((M_pad, MELP), jnp.float32),
        grid_spec=pltpu.PrefetchScalarGridSpec(
            num_scalar_prefetch=0,
            grid=(M_pad // TM, NF // NFT, KP // TK),
            in_specs=[
                pl.BlockSpec((TM, TK), lambda i, nf, k: (i, k)),
                pl.BlockSpec((1, TK), lambda i, nf, k: (0, k)),
                pl.BlockSpec((TK, 2 * NFT), lambda i, nf, k: (k, nf)),
                pl.BlockSpec((NFT, MELP), lambda i, nf, k: (nf, 0)),
            ],
            out_specs=pl.BlockSpec((TM, MELP), lambda i, nf, k: (i, 0)),
            scratch_shapes=[pltpu.VMEM((TM, 2 * NFT), jnp.float32),
                            pltpu.VMEM((TM, MELP), jnp.float32)],
        ),
        compiler_params=pltpu.CompilerParams(
            dimension_semantics=("parallel", "arbitrary", "arbitrary"),
            vmem_limit_bytes=vmem_limit),
    )(frames, win, params["basis"], params["melfb"])

    # PyTorch NCHW mel spectrogram (B, 1, n_mels, n_time) -- already log'd if requested.
    mel_c = mel_flat[:B * TP].reshape(B, TP, MELP)[:, :n_time, :n_mels]
    s = jnp.transpose(mel_c, (0, 2, 1))[:, None, :, :]

    # ---- kernel 2: compact bf16 features, K-tiled fc1 -> ReLU -> fc2 ---------
    B_pad = _round_up(B, 8)
    x_mlp = mel_c.reshape(B, D_in)
    x_mlp = jnp.pad(x_mlp, ((0, B_pad - B), (0, D_pad2 - D_in))).astype(jnp.bfloat16)

    partial_logits = pl.pallas_call(
        _mlp_kernel,
        out_shape=jax.ShapeDtypeStruct((NSPLIT, B_pad, CP), jnp.float32),
        grid_spec=pltpu.PrefetchScalarGridSpec(
            num_scalar_prefetch=0,
            grid=(NSPLIT, D_pad2 // TKD),
            in_specs=[
                pl.BlockSpec((B_pad, TKD), lambda h, k: (0, k)),
                pl.BlockSpec((1, TKD, H2), lambda h, k: (h, k, 0)),
                pl.BlockSpec((1, 1, H2), lambda h, k: (h, 0, 0)),
                pl.BlockSpec((1, H2, CP), lambda h, k: (h, 0, 0)),
            ],
            out_specs=pl.BlockSpec((1, B_pad, CP), lambda h, k: (h, 0, 0)),
            scratch_shapes=[pltpu.VMEM((B_pad, H2), jnp.float32)],
        ),
        compiler_params=pltpu.CompilerParams(
            dimension_semantics=("parallel", "arbitrary"),
            vmem_limit_bytes=vmem_limit),
    )(x_mlp, params["w1p"], params["b1p"], params["w2p"])

    logits = jnp.sum(partial_logits, axis=0) + params["b2p"]  # add fc2 bias once
    return logits[:B, :n_classes], s


if __name__ == "__main__":
    # Small shapes consistent with the module's forward:
    #   x: (batch=2, n_points=8), hop_length=1, n_mels=8, sample_rate=16
    #   mel spectrogram: (n_mels, n_points//hop + 1) = (8, 9); fc1: 72 -> 32; fc2: 32 -> 4
    batch, n_points, hop_length = 2, 8, 1
    n_mels, sample_rate = 8, 16
    n_classes, hidden = 4, 32
    n_time = n_points // hop_length + 1

    key = jax.random.PRNGKey(0)
    kx, kp = jax.random.split(key)
    x = jax.random.normal(kx, (batch, n_points), dtype=jnp.float32)
    params = init_params(kp, n_points=n_points, hop_length=hop_length,
                         n_mels=n_mels, n_classes=n_classes, hidden=hidden,
                         init_lambd=3.0, sample_rate=sample_rate)

    fwd = jax.jit(functools.partial(
        melmlpnet_forward, n_mels=n_mels, n_classes=n_classes,
        hop_length=hop_length, normalize_window=False, energy_normalize=False))

    logits, s = fwd(x, params)
    jax.block_until_ready((logits, s))

    assert logits.shape == (batch, n_classes)
    assert s.shape == (batch, 1, n_mels, n_time)
    assert bool(jnp.all(jnp.isfinite(logits))) and bool(jnp.all(jnp.isfinite(s)))
    print("KERNEL_OK")
</pallas_src>

<mosaic_0001>
module attributes {stable_mosaic.version = 11 : i64} {
  func.func @_melspec_kernel(%arg0: i32, %arg1: i32, %arg2: i32, %arg3: memref<32x128xbf16, #tpu.memory_space<vmem>>, %arg4: memref<1x128xbf16, #tpu.memory_space<vmem>>, %arg5: memref<128x256xbf16, #tpu.memory_space<vmem>>, %arg6: memref<128x128xbf16, #tpu.memory_space<vmem>>, %arg7: memref<32x128xf32, #tpu.memory_space<vmem>>, %arg8: memref<32x256xf32, #tpu.memory_space<vmem>>, %arg9: memref<32x128xf32, #tpu.memory_space<vmem>>) attributes {dimension_semantics = [#tpu.dimension_semantics<parallel>, #tpu.dimension_semantics<arbitrary>, #tpu.dimension_semantics<arbitrary>], iteration_bounds = array<i64: 1, 1, 1>, scalar_prefetch = 0 : i64, scratch_operands = 2 : i64, tpu.core_type = #tpu.core_type<tc>, window_params = [{transform_indices = @transform_0, window_bounds = array<i64: 32, 128>}, {transform_indices = @transform_1, window_bounds = array<i64: 1, 128>}, {transform_indices = @transform_2, window_bounds = array<i64: 128, 256>}, {transform_indices = @transform_3, window_bounds = array<i64: 128, 128>}, {transform_indices = @transform_4, window_bounds = array<i64: 32, 128>}]} {
    %c0_i32 = arith.constant 0 : i32
    %0 = arith.cmpi eq, %arg1, %c0_i32 : i32
    %c0_i32_0 = arith.constant 0 : i32
    %1 = arith.cmpi eq, %arg2, %c0_i32_0 : i32
    %2 = arith.andi %0, %1 : i1
    %3 = arith.extui %2 : i1 to i32
    %c0_i32_1 = arith.constant 0 : i32
    %4 = arith.cmpi ne, %3, %c0_i32_1 : i32
    scf.if %4 {
      %cst_18 = arith.constant 0.000000e+00 : f32
      %25 = vector.broadcast %cst_18 : f32 to vector<32x128xf32>
      %c0_19 = arith.constant 0 : index
      %c0_20 = arith.constant 0 : index
      %26 = vector.load %arg9[%c0_19, %c0_20] : memref<32x128xf32, #tpu.memory_space<vmem>>, vector<32x128xf32>
      tpu.vector_store %arg9[%c0_19, %c0_20], %25 {strides = array<i32>} : memref<32x128xf32, #tpu.memory_space<vmem>>, vector<32x128xf32>,
    } else {
    }
    %c0_i32_2 = arith.constant 0 : i32
    %5 = arith.cmpi eq, %arg2, %c0_i32_2 : i32
    %6 = arith.extui %5 : i1 to i32
    %c0_i32_3 = arith.constant 0 : i32
    %7 = arith.cmpi ne, %6, %c0_i32_3 : i32
    scf.if %7 {
      %cst_18 = arith.constant 0.000000e+00 : f32
      %25 = vector.broadcast %cst_18 : f32 to vector<32x256xf32>
      %c0_19 = arith.constant 0 : index
      %c0_20 = arith.constant 0 : index
      %26 = vector.load %arg8[%c0_19, %c0_20] : memref<32x256xf32, #tpu.memory_space<vmem>>, vector<32x256xf32>
      tpu.vector_store %arg8[%c0_19, %c0_20], %25 {strides = array<i32>} : memref<32x256xf32, #tpu.memory_space<vmem>>, vector<32x256xf32>,
    } else {
    }
    %c0 = arith.constant 0 : index
    %c0_4 = arith.constant 0 : index
    %8 = vector.load %arg3[%c0, %c0_4] : memref<32x128xbf16, #tpu.memory_space<vmem>>, vector<32x128xbf16>
    %c0_5 = arith.constant 0 : index
    %c0_6 = arith.constant 0 : index
    %9 = vector.load %arg4[%c0_5, %c0_6] : memref<1x128xbf16, #tpu.memory_space<vmem>>, vector<1x128xbf16>
    %10 = vector.broadcast %9 : vector<1x128xbf16> to vector<32x128xbf16>
    %11 = arith.mulf %8, %10 : vector<32x128xbf16>
    %c0_7 = arith.constant 0 : index
    %c0_8 = arith.constant 0 : index
    %12 = vector.load %arg8[%c0_7, %c0_8] : memref<32x256xf32, #tpu.memory_space<vmem>>, vector<32x256xf32>
    %c0_9 = arith.constant 0 : index
    %c0_10 = arith.constant 0 : index
    %13 = vector.load %arg5[%c0_9, %c0_10] : memref<128x256xbf16, #tpu.memory_space<vmem>>, vector<128x256xbf16>
    %cst = arith.constant dense<0.000000e+00> : vector<32x256xf32>
    %14 = tpu.matmul %11, %13, %cst {dimension_numbers = #tpu.dot_dimension_numbers<[1], [0], [0], [1], [0, 0, 1, 1], [], []>} : vector<32x128xbf16>, vector<128x256xbf16>, vector<32x256xf32> -> vector<32x256xf32>
    %15 = arith.addf %12, %14 : vector<32x256xf32>
    %c0_11 = arith.constant 0 : index
    %c0_12 = arith.constant 0 : index
    %16 = vector.load %arg8[%c0_11, %c0_12] : memref<32x256xf32, #tpu.memory_space<vmem>>, vector<32x256xf32>
    tpu.vector_store %arg8[%c0_11, %c0_12], %15 {strides = array<i32>} : memref<32x256xf32, #tpu.memory_space<vmem>>, vector<32x256xf32>,
    %c0_i32_13 = arith.constant 0 : i32
    %17 = arith.cmpi eq, %arg2, %c0_i32_13 : i32
    %18 = arith.extui %17 : i1 to i32
    %c0_i32_14 = arith.constant 0 : i32
    %19 = arith.cmpi ne, %18, %c0_i32_14 : i32
    scf.if %19 {
      %c0_18 = arith.constant 0 : index
      %c0_19 = arith.constant 0 : index
      %25 = vector.load %arg8[%c0_18, %c0_19] : memref<32x256xf32, #tpu.memory_space<vmem>>, vector<32x128xf32>
      %c0_20 = arith.constant 0 : index
      %c128 = arith.constant 128 : index
      %26 = vector.load %arg8[%c0_20, %c128] : memref<32x256xf32, #tpu.memory_space<vmem>>, vector<32x128xf32>
      %27 = arith.mulf %25, %25 : vector<32x128xf32>
      %28 = arith.mulf %26, %26 : vector<32x128xf32>
      %29 = arith.addf %27, %28 : vector<32x128xf32>
      %30 = arith.truncf %29 : vector<32x128xf32> to vector<32x128xbf16>
      %c0_21 = arith.constant 0 : index
      %c0_22 = arith.constant 0 : index
      %31 = vector.load %arg9[%c0_21, %c0_22] : memref<32x128xf32, #tpu.memory_space<vmem>>, vector<32x128xf32>
      %c0_23 = arith.constant 0 : index
      %c0_24 = arith.constant 0 : index
      %32 = vector.load %arg6[%c0_23, %c0_24] : memref<128x128xbf16, #tpu.memory_space<vmem>>, vector<128x128xbf16>
      %cst_25 = arith.constant dense<0.000000e+00> : vector<32x128xf32>
      %33 = tpu.matmul %30, %32, %cst_25 {dimension_numbers = #tpu.dot_dimension_numbers<[1], [0], [0], [1], [0, 0, 1, 1], [], []>} : vector<32x128xbf16>, vector<128x128xbf16>, vector<32x128xf32> -> vector<32x128xf32>
      %34 = arith.addf %31, %33 : vector<32x128xf32>
      %c0_26 = arith.constant 0 : index
      %c0_27 = arith.constant 0 : index
      %35 = vector.load %arg9[%c0_26, %c0_27] : memref<32x128xf32, #tpu.memory_space<vmem>>, vector<32x128xf32>
      tpu.vector_store %arg9[%c0_26, %c0_27], %34 {strides = array<i32>} : memref<32x128xf32, #tpu.memory_space<vmem>>, vector<32x128xf32>,
    } else {
    }
    %c0_i32_15 = arith.constant 0 : i32
    %20 = arith.cmpi eq, %arg2, %c0_i32_15 : i32
    %c0_i32_16 = arith.constant 0 : i32
    %21 = arith.cmpi eq, %arg1, %c0_i32_16 : i32
    %22 = arith.andi %20, %21 : i1
    %23 = arith.extui %22 : i1 to i32
    %c0_i32_17 = arith.constant 0 : i32
    %24 = arith.cmpi ne, %23, %c0_i32_17 : i32
    scf.if %24 {
      %c0_18 = arith.constant 0 : index
      %c0_19 = arith.constant 0 : index
      %25 = vector.load %arg9[%c0_18, %c0_19] : memref<32x128xf32, #tpu.memory_space<vmem>>, vector<32x128xf32>
      %c0_20 = arith.constant 0 : index
      %c0_21 = arith.constant 0 : index
      %26 = vector.load %arg7[%c0_20, %c0_21] : memref<32x128xf32, #tpu.memory_space<vmem>>, vector<32x128xf32>
      tpu.vector_store %arg7[%c0_20, %c0_21], %25 {strides = array<i32>} : memref<32x128xf32, #tpu.memory_space<vmem>>, vector<32x128xf32>,
    } else {
    }
    return
  }
  func.func @transform_0(%arg0: i32, %arg1: i32, %arg2: i32) -> (i32, i32) {
    %c0_i32 = arith.constant 0 : i32
    return %arg0, %arg2 : i32, i32
  }
  func.func @transform_1(%arg0: i32, %arg1: i32, %arg2: i32) -> (i32, i32) {
    %c0_i32 = arith.constant 0 : i32
    %c0_i32_0 = arith.constant 0 : i32
    return %c0_i32, %arg2 : i32, i32
  }
  func.func @transform_2(%arg0: i32, %arg1: i32, %arg2: i32) -> (i32, i32) {
    %c0_i32 = arith.constant 0 : i32
    return %arg2, %arg1 : i32, i32
  }
  func.func @transform_3(%arg0: i32, %arg1: i32, %arg2: i32) -> (i32, i32) {
    %c0_i32 = arith.constant 0 : i32
    %c0_i32_0 = arith.constant 0 : i32
    return %arg1, %c0_i32 : i32, i32
  }
  func.func @transform_4(%arg0: i32, %arg1: i32, %arg2: i32) -> (i32, i32) {
    %c0_i32 = arith.constant 0 : i32
    %c0_i32_0 = arith.constant 0 : i32
    return %arg0, %c0_i32 : i32, i32
  }
}

module attributes {stable_mosaic.version = 11 : i64} {
  func.func @_mlp_kernel(%arg0: i32, %arg1: i32, %arg2: memref<8x128xbf16, #tpu.memory_space<vmem>>, %arg3: memref<1x128x16xbf16, #tpu.memory_space<vmem>>, %arg4: memref<1x1x16xf32, #tpu.memory_space<vmem>>, %arg5: memref<1x16x128xf32, #tpu.memory_space<vmem>>, %arg6: memref<1x8x128xf32, #tpu.memory_space<vmem>>, %arg7: memref<8x16xf32, #tpu.memory_space<vmem>>) attributes {dimension_semantics = [#tpu.dimension_semantics<parallel>, #tpu.dimension_semantics<arbitrary>], iteration_bounds = array<i64: 2, 1>, scalar_prefetch = 0 : i64, scratch_operands = 1 : i64, tpu.core_type = #tpu.core_type<tc>, window_params = [{transform_indices = @transform_0, window_bounds = array<i64: 8, 128>}, {transform_indices = @transform_1, window_bounds = array<i64: 1, 128, 16>}, {transform_indices = @transform_2, window_bounds = array<i64: 1, 1, 16>}, {transform_indices = @transform_3, window_bounds = array<i64: 1, 16, 128>}, {transform_indices = @transform_4, window_bounds = array<i64: 1, 8, 128>}]} {
    %c0_i32 = arith.constant 0 : i32
    %0 = arith.cmpi eq, %arg1, %c0_i32 : i32
    %1 = arith.extui %0 : i1 to i32
    %c0_i32_0 = arith.constant 0 : i32
    %2 = arith.cmpi ne, %1, %c0_i32_0 : i32
    scf.if %2 {
      %cst_11 = arith.constant 0.000000e+00 : f32
      %13 = vector.broadcast %cst_11 : f32 to vector<8x16xf32>
      %c0_12 = arith.constant 0 : index
      %c0_13 = arith.constant 0 : index
      %14 = vector.load %arg7[%c0_12, %c0_13] : memref<8x16xf32, #tpu.memory_space<vmem>>, vector<8x16xf32>
      tpu.vector_store %arg7[%c0_12, %c0_13], %13 {strides = array<i32>} : memref<8x16xf32, #tpu.memory_space<vmem>>, vector<8x16xf32>,
    } else {
    }
    %c0 = arith.constant 0 : index
    %c0_1 = arith.constant 0 : index
    %3 = vector.load %arg7[%c0, %c0_1] : memref<8x16xf32, #tpu.memory_space<vmem>>, vector<8x16xf32>
    %c0_2 = arith.constant 0 : index
    %c0_3 = arith.constant 0 : index
    %4 = vector.load %arg2[%c0_2, %c0_3] : memref<8x128xbf16, #tpu.memory_space<vmem>>, vector<8x128xbf16>
    %c0_4 = arith.constant 0 : index
    %c0_5 = arith.constant 0 : index
    %c0_6 = arith.constant 0 : index
    %5 = vector.load %arg3[%c0_4, %c0_5, %c0_6] : memref<1x128x16xbf16, #tpu.memory_space<vmem>>, vector<1x128x16xbf16>
    %6 = vector.shape_cast %5 : vector<1x128x16xbf16> to vector<128x16xbf16>
    %cst = arith.constant dense<0.000000e+00> : vector<8x16xf32>
    %7 = tpu.matmul %4, %6, %cst {dimension_numbers = #tpu.dot_dimension_numbers<[1], [0], [0], [1], [0, 0, 1, 1], [], []>} : vector<8x128xbf16>, vector<128x16xbf16>, vector<8x16xf32> -> vector<8x16xf32>
    %8 = arith.addf %3, %7 : vector<8x16xf32>
    %c0_7 = arith.constant 0 : index
    %c0_8 = arith.constant 0 : index
    %9 = vector.load %arg7[%c0_7, %c0_8] : memref<8x16xf32, #tpu.memory_space<vmem>>, vector<8x16xf32>
    tpu.vector_store %arg7[%c0_7, %c0_8], %8 {strides = array<i32>} : memref<8x16xf32, #tpu.memory_space<vmem>>, vector<8x16xf32>,
    %c0_i32_9 = arith.constant 0 : i32
    %10 = arith.cmpi eq, %arg1, %c0_i32_9 : i32
    %11 = arith.extui %10 : i1 to i32
    %c0_i32_10 = arith.constant 0 : i32
    %12 = arith.cmpi ne, %11, %c0_i32_10 : i32
    scf.if %12 {
      %c0_11 = arith.constant 0 : index
      %c0_12 = arith.constant 0 : index
      %13 = vector.load %arg7[%c0_11, %c0_12] : memref<8x16xf32, #tpu.memory_space<vmem>>, vector<8x16xf32>
      %c0_13 = arith.constant 0 : index
      %c0_14 = arith.constant 0 : index
      %c0_15 = arith.constant 0 : index
      %14 = vector.load %arg4[%c0_13, %c0_14, %c0_15] : memref<1x1x16xf32, #tpu.memory_space<vmem>>, vector<1x1x16xf32>
      %15 = vector.shape_cast %14 : vector<1x1x16xf32> to vector<1x16xf32>
      %16 = vector.broadcast %15 : vector<1x16xf32> to vector<8x16xf32>
      %17 = arith.addf %13, %16 : vector<8x16xf32>
      %cst_16 = arith.constant 0.000000e+00 : f32
      %18 = vector.broadcast %cst_16 : f32 to vector<8x16xf32>
      %19 = arith.maximumf %17, %18 : vector<8x16xf32>
      %c0_17 = arith.constant 0 : index
      %c0_18 = arith.constant 0 : index
      %c0_19 = arith.constant 0 : index
      %20 = vector.load %arg5[%c0_17, %c0_18, %c0_19] : memref<1x16x128xf32, #tpu.memory_space<vmem>>, vector<1x16x128xf32>
      %21 = vector.shape_cast %20 : vector<1x16x128xf32> to vector<16x128xf32>
      %cst_20 = arith.constant dense<0.000000e+00> : vector<8x128xf32>
      %22 = tpu.matmul %19, %21, %cst_20 {dimension_numbers = #tpu.dot_dimension_numbers<[1], [0], [0], [1], [0, 0, 1, 1], [], []>} : vector<8x16xf32>, vector<16x128xf32>, vector<8x128xf32> -> vector<8x128xf32>
      %c0_21 = arith.constant 0 : index
      %c0_22 = arith.constant 0 : index
      %c0_23 = arith.constant 0 : index
      %23 = vector.load %arg6[%c0_21, %c0_22, %c0_23] : memref<1x8x128xf32, #tpu.memory_space<vmem>>, vector<1x8x128xf32>
      %24 = vector.shape_cast %23 : vector<1x8x128xf32> to vector<8x128xf32>
      %25 = vector.shape_cast %22 : vector<8x128xf32> to vector<1x8x128xf32>
      tpu.vector_store %arg6[%c0_21, %c0_22, %c0_23], %25 {strides = array<i32>} : memref<1x8x128xf32, #tpu.memory_space<vmem>>, vector<1x8x128xf32>,
    } else {
    }
    return
  }
  func.func @transform_0(%arg0: i32, %arg1: i32) -> (i32, i32) {
    %c0_i32 = arith.constant 0 : i32
    %c0_i32_0 = arith.constant 0 : i32
    return %c0_i32, %arg1 : i32, i32
  }
  func.func @transform_1(%arg0: i32, %arg1: i32) -> (i32, i32, i32) {
    %c0_i32 = arith.constant 0 : i32
    %c0_i32_0 = arith.constant 0 : i32
    return %arg0, %arg1, %c0_i32 : i32, i32, i32
  }
  func.func @transform_2(%arg0: i32, %arg1: i32) -> (i32, i32, i32) {
    %c0_i32 = arith.constant 0 : i32
    %c0_i32_0 = arith.constant 0 : i32
    %c0_i32_1 = arith.constant 0 : i32
    return %arg0, %c0_i32, %c0_i32_0 : i32, i32, i32
  }
  func.func @transform_3(%arg0: i32, %arg1: i32) -> (i32, i32, i32) {
    %c0_i32 = arith.constant 0 : i32
    %c0_i32_0 = arith.constant 0 : i32
    %c0_i32_1 = arith.constant 0 : i32
    return %arg0, %c0_i32, %c0_i32_0 : i32, i32, i32
  }
  func.func @transform_4(%arg0: i32, %arg1: i32) -> (i32, i32, i32) {
    %c0_i32 = arith.constant 0 : i32
    %c0_i32_0 = arith.constant 0 : i32
    %c0_i32_1 = arith.constant 0 : i32
    return %arg0, %c0_i32, %c0_i32_0 : i32, i32, i32
  }
}

</mosaic_0001>

<bundles_post_ra>
// kernel: melmlpnet_forward.3
= control target key start
LH: loop header
LB: loop body
LE: loop exit
PB: predicated region body
PF: predicated region fallthrough
CT: control target
= control target key end

     0   :  { %s733_s15 = smov 0   ;;  %s735_s16 = smov 0   ;;  %s784_s0 = inlined_call_operand.vmem [shape: bf16[8,128], index: 0, kind: input, shape index: {}]   ;;  %s785_s1 = inlined_call_operand.vmem [shape: bf16[2,128,16], index: 1, kind: input, shape index: {}]   ;;  %s786_s2 = inlined_call_operand.vmem [shape: f32[2,1,16], index: 2, kind: input, shape index: {}]   ;;  %s787_s3 = inlined_call_operand.vmem [shape: f32[2,16,128], index: 3, kind: input, shape index: {}]   ;;  %s788_s4 = inlined_call_operand.vmem [shape: f32[2,8,128], index: 4, kind: output, shape index: {}]  }
   0x1   :  { %s737_s17 = smov 0  }
   0x2 LB: > { %s26_s18 = sadd.s32 1, %s700_s16  ;;  %p589_p0 = scmp.ge.s32.totalorder %s704_s17, 1  ;;  %s704_s17 = sphi %s737_s17, %s14_s17   ;;  %s700_s16 = sphi %s735_s16, %s790_s16   ;;  %s696_s15 = sphi %s733_s15, %s789_s15  }
   0x3   : > { %p28_p1 = scmp.ge.s32.totalorder %s26_s18, 2  ;;  %p208_p2 = scmp.lt.s32.totalorder %s704_s17, 3 }
   0x5   : > { %s792_s18 = smov (%p28_p1, %s26_s18), 0  ;;  %p209_p3 = pnand %p589_p0, %p208_p2 }
   0x6   : > { %p254_p4 = scmp.lt.s32.totalorder (!%p209_p3), %s696_s15, 1 }
   0x7   : > { %212 = sbr.rel (%p209_p3) target bundleno = 449 (0x1c1), region = 36 }
   0xc   : > { %vm280_vm0 = vcmask 130048   ;;  %v706_v0 = vmov 0.0   ;;  %vm707_vm1 = vmmov 0   ;;  %s794_s15 = smov (!%p254_p4, %s696_s15), 1  ;;  %v283_v9 = vld [vmem:[%s784_s0] sm:$0xf] }
   0xd   : > { %621 = vmatprep.subr.bf16.mxu0 %v706_v0  ;;  %637 = vmatprep.mubr.msk.bf16.mxu0 %vm707_vm1, %v706_v0  ;;  %281 = vst.msk [vmem:[#allocation2] sm:$0xff] %vm280_vm0, %v706_v0  ;;  %s607_s19 = sshll.u32 %s794_s15, 6  ;;  %s608_s25 = sshll.u32 %s794_s15, 4 }
   0xe   : > { %641 = vmatprep.subr.mxu1 %v706_v0  ;;  %645 = vmatprep.mubr.msk.f32.mxu1 %vm707_vm1, %v706_v0  ;;  %s261_s22 = scalar_lea.vmem %s785_s1, %s607_s19  ;;  %s270_s28 = scalar_lea.vmem %s787_s3, %s608_s25 }
   0xf   : > { %v674_v1 = vld [vmem:[%s261_s22 + $0x38] sm:$0xff]   ;;  %v675_v2 = vld [vmem:[%s261_s22 + $0x30] sm:$0xff]   ;;  %v676_v3 = vld [vmem:[%s261_s22 + $0x28] sm:$0xff]   ;;  %s265_s5 = scalar_lea.vmem %s786_s2, %s794_s15  ;;  %s594_s6 = sshll.u32 %s794_s15, 3 }
  0x10   : > { %622 = vmatpush3.bf16.msra.mxu0 %v674_v1  ;;  %v677_v4 = vld [vmem:[%s261_s22 + $0x20] sm:$0xff]   ;;  %v678_v5 = vld [vmem:[%s261_s22 + $0x18] sm:$0xff]   ;;  %v679_v6 = vld [vmem:[%s261_s22 + $0x10] sm:$0xff]   ;;  %s274_s9 = scalar_lea.vmem %s788_s4, %s594_s6 }
  0x11   : > { %623 = vmatprep.subr.bf16.mxu0 %v706_v0  ;;  %v680_v7 = vld [vmem:[%s261_s22 + $0x8] sm:$0xff]   ;;  %v681_v8 = vld [vmem:[%s261_s22] sm:$0xff]  }
  0x12   : > { %v405_v10 = vld [vmem:[%s270_s28 + $0x8] sm:$0xff]  ;;  %v404_v11 = vld [vmem:[%s270_s28] sm:$0xff] }
  0x13   : > { %642 = vmatpush3.msra.mxu1 %v405_v10  ;;  %v603_v18 = vld [vmem:[%s265_s5] ss:$0 sm:$0xff] }
  0x14   : > { %624 = vmatpush3.bf16.msra.mxu0 %v675_v2  ;;  %643 = vmatprep.subr.mxu1 %v706_v0  ;;  %v282_v12 = vld [vmem:[#allocation2] sm:$0xff] }
  0x15   : > { %625 = vmatprep.subr.bf16.mxu0 %v706_v0  ;;  %644 = vmatpush3.msra.mxu1 %v404_v11 }
  0x18   : > { %626 = vmatpush3.bf16.msra.mxu0 %v676_v3 }
  0x19   : > { %627 = vmatprep.subr.bf16.mxu0 %v706_v0 }
  0x1c   : > { %628 = vmatpush3.bf16.msra.mxu0 %v677_v4 }
  0x1d   : > { %629 = vmatprep.subr.bf16.mxu0 %v706_v0 }
  0x20   : > { %630 = vmatpush3.bf16.msra.mxu0 %v678_v5 }
  0x21   : > { %631 = vmatprep.subr.bf16.mxu0 %v706_v0 }
  0x24   : > { %632 = vmatpush3.bf16.msra.mxu0 %v679_v6 }
  0x25   : > { %633 = vmatprep.subr.bf16.mxu0 %v706_v0 }
  0x28   : > { %634 = vmatpush3.bf16.msra.mxu0 %v680_v7 }
  0x29   : > { %635 = vmatprep.subr.bf16.mxu0 %v706_v0 }
  0x2c   : > { %636 = vmatpush3.bf16.msra.mxu0 %v681_v8 }
  0x2f   : > { %638 = vmatmul.mubr.bf16.vlgmr.msra.gmra.mxu0 %v283_v9 }
  0xef   : > { %v382_v13 = vpop.f32.mrf.mxu0 }
  0xf0   : > { %v388_v14 = vadd.f32 %v382_v13, %v282_v12 }
  0xf1   : > { %v639_v15 = vpop.f32.mrf.mxu0 }
  0xf2   : > { %390 = vst.msk [vmem:[#allocation2] sm:$0xff] %vm280_vm0, %v388_v14 }
  0xf3   : > { %v385_v16 = vpop.f32.mrf.mxu0 }
  0xf5   : > { %v640_v17 = vpop.f32.mrf.mxu0 }
  0xf9   : > { %v394_v19 = vld [vmem:[#allocation2] sm:$0xff] }
  0xfa   : > { %v402_v20 = vadd.f32 %v603_v18, %v394_v19 }
  0xfc   : > { %v403_v21 = vmax.f32 %v402_v20, 0.0 }
  0xfe   : > { %646 = vmatmul.mubr.msk.f32.vlgmr.msra.gmra.mxu1 %vm280_vm0, %v403_v21 }
 0x1be   : > { %v475_v22 = vpop.f32.mrf.mxu1 }
 0x1bf   : > { %479 = vst [vmem:[%s274_s9] sm:$0xff] %v475_v22 }
 0x1c0   : > { %v647_v23 = vpop.f32.mrf.mxu1 }
 0x1c1 PF: > { %s14_s17 = sadd.s32 1, %s704_s17   ;;  %s789_s15 = smov %s700_s16 }
 0x1c2   : > { %p11_p5 = scmp.ge.s32.totalorder %s14_s17, 4   ;;  %s790_s16 = smov %s792_s18 }
 0x1c4   :  { %13 = sbr.rel (!%p11_p5) target bundleno = 2 (0x2), region = 83 }

// kernel: melmlpnet_forward.2
= control target key start
LH: loop header
LB: loop body
LE: loop exit
PB: predicated region body
PF: predicated region fallthrough
CT: control target
= control target key end

     0   :  { %v498_v1 = vmov 0   ;;  %v47_v6 = vlaneseq  ;;  %s623_s2 = inlined_call_operand.vmem [shape: bf16[128,256], index: 2, kind: input, shape index: {}]   ;;  %s624_s1 = inlined_call_operand.vmem [shape: bf16[1,128], index: 1, kind: input, shape index: {}]   ;;  %s625_s3 = inlined_call_operand.vmem [shape: bf16[128,128], index: 3, kind: input, shape index: {}]   ;;  %s626_s0 = inlined_call_operand.vmem [shape: bf16[32,128], index: 0, kind: input, shape index: {}]   ;;  %s627_s4 = inlined_call_operand.vmem [shape: f32[32,128], index: 4, kind: output, shape index: {}]  }
   0x1   :  { %v466_v0 = vld [vmem:[%s623_s2 + $0x74] ss:$8 sps:$4 sm:$0xff]   ;;  %207 = vmatprep.mubr.bf16.mxu0 %v498_v1  ;;  %v468_v2 = vld [vmem:[%s623_s2 + $0x70] ss:$8 sps:$4 sm:$0xff]   ;;  %v469_v3 = vld [vmem:[%s623_s2 + $0x64] ss:$8 sps:$4 sm:$0xff]  }
   0x2   :  { %175 = vmatprep.subr.bf16.mxu0 %v466_v0  ;;  %v471_v4 = vld [vmem:[%s623_s2 + $0x60] ss:$8 sps:$4 sm:$0xff]   ;;  %v472_v5 = vld [vmem:[%s623_s2 + $0x54] ss:$8 sps:$4 sm:$0xff]   ;;  %v474_v7 = vld [vmem:[%s623_s2 + $0x50] ss:$8 sps:$4 sm:$0xff]  }
   0x3   :  { %176 = vmatpush1.bf16.msra.mxu0 %v468_v2  ;;  %v475_v8 = vld [vmem:[%s623_s2 + $0x44] ss:$8 sps:$4 sm:$0xff]   ;;  %v48_v9 = vshrl.u32 %v47_v6, 7  ;;  %v477_v10 = vld [vmem:[%s623_s2 + $0x40] ss:$8 sps:$4 sm:$0xff]   ;;  %v490_v14 = vld [vmem:[%s625_s3 + $0x38] sm:$0xff]  }
   0x4   :  { %177 = vmatprep.subr.bf16.mxu0 %v469_v3  ;;  %v43_v11 = vld [vmem:[%s624_s1] sm:$0x1]  ;;  %v478_v12 = vld [vmem:[%s623_s2 + $0x34] ss:$8 sps:$4 sm:$0xff]   ;;  %v480_v13 = vld [vmem:[%s623_s2 + $0x30] ss:$8 sps:$4 sm:$0xff]   ;;  %445 = vmatprep.subr.bf16.mxu1 %v490_v14 }
   0x5   :  { %v481_v15 = vld [vmem:[%s623_s2 + $0x24] ss:$8 sps:$4 sm:$0xff]   ;;  %v45_v16 = vpack.i.b16 %v43_v11, %v43_v11  ;;  %v49_v17 = vsub.s32 0, %v48_v9  ;;  %v491_v18 = vld [vmem:[%s625_s3 + $0x30] sm:$0xff]   ;;  %446 = vmatpush3.bf16.msra.mxu1 %v490_v14  ;;  %v483_v21 = vld [vmem:[%s623_s2 + $0x20] ss:$8 sps:$4 sm:$0xff]  }
   0x6   :  { %v492_v19 = vld [vmem:[%s625_s3 + $0x28] sm:$0xff]   ;;  %447 = vmatprep.subr.bf16.mxu1 %v491_v18  ;;  %v484_v22 = vld [vmem:[%s623_s2 + $0x14] ss:$8 sps:$4 sm:$0xff]   ;;  %v486_v24 = vld [vmem:[%s623_s2 + $0x10] ss:$8 sps:$4 sm:$0xff]  }
   0x7   :  { %178 = vmatpush1.bf16.msra.mxu0 %v471_v4  ;;  %v50_v20 = vrot.slane %v45_v16, %v49_v17  ;;  %v39_v25 = vld [vmem:[%s626_s0] sm:$0xf]  ;;  %v40_v26 = vld [vmem:[%s626_s0 + $0x4] sm:$0xf]  ;;  %v41_v32 = vld [vmem:[%s626_s0 + $0x8] sm:$0xf] }
   0x8   :  { %179 = vmatprep.subr.bf16.mxu0 %v472_v5  ;;  %v487_v27 = vld [vmem:[%s623_s2 + $0x4] ss:$8 sps:$4 sm:$0xff]   ;;  %v489_v30 = vld [vmem:[%s623_s2] ss:$8 sps:$4 sm:$0xff]   ;;  %v494_v38 = vld [vmem:[%s625_s3 + $0x18] sm:$0xff]  }
   0x9   :  { %448 = vmatpush3.bf16.msra.mxu1 %v491_v18  ;;  %v408_v23 = vcombine.low %v50_v20, %v50_v20  ;;  %v42_v33 = vld [vmem:[%s626_s0 + $0xc] sm:$0xf]  ;;  %v493_v37 = vld [vmem:[%s625_s3 + $0x20] sm:$0xff]   ;;  %v495_v39 = vld [vmem:[%s625_s3 + $0x10] sm:$0xff]  }
   0xa   :  { %449 = vmatprep.subr.bf16.mxu1 %v492_v19  ;;  %v496_v40 = vld [vmem:[%s625_s3 + $0x8] sm:$0xff]   ;;  %v497_v41 = vld [vmem:[%s625_s3] sm:$0xff]  }
   0xb   :  { %180 = vmatpush1.bf16.msra.mxu0 %v474_v7  ;;  %v55_v28 = vmul.bf16 %v408_v23, %v39_v25  ;;  %v56_v29 = vmul.bf16 %v408_v23, %v40_v26  ;;  %v57_v34 = vmul.bf16 %v408_v23, %v41_v32  ;;  %v58_v35 = vmul.bf16 %v408_v23, %v42_v33 }
   0xc   :  { %181 = vmatprep.subr.bf16.mxu0 %v475_v8 }
   0xd   :  { %450 = vmatpush3.bf16.msra.mxu1 %v492_v19  ;;  %v409_v31 = vcombine.low %v55_v28, %v56_v29  ;;  %v410_v36 = vcombine.low %v57_v34, %v58_v35 }
   0xe   :  { %451 = vmatprep.subr.bf16.mxu1 %v493_v37 }
   0xf   :  { %182 = vmatpush1.bf16.msra.mxu0 %v477_v10 }
  0x10   :  { %183 = vmatprep.subr.bf16.mxu0 %v478_v12 }
  0x11   :  { %452 = vmatpush3.bf16.msra.mxu1 %v493_v37 }
  0x12   :  { %453 = vmatprep.subr.bf16.mxu1 %v494_v38 }
  0x13   :  { %184 = vmatpush1.bf16.msra.mxu0 %v480_v13 }
  0x14   :  { %185 = vmatprep.subr.bf16.mxu0 %v481_v15 }
  0x15   :  { %454 = vmatpush3.bf16.msra.mxu1 %v494_v38 }
  0x16   :  { %455 = vmatprep.subr.bf16.mxu1 %v495_v39 }
  0x17   :  { %186 = vmatpush1.bf16.msra.mxu0 %v483_v21 }
  0x18   :  { %187 = vmatprep.subr.bf16.mxu0 %v484_v22 }
  0x19   :  { %456 = vmatpush3.bf16.msra.mxu1 %v495_v39 }
  0x1a   :  { %457 = vmatprep.subr.bf16.mxu1 %v496_v40 }
  0x1b   :  { %188 = vmatpush1.bf16.msra.mxu0 %v486_v24 }
  0x1c   :  { %189 = vmatprep.subr.bf16.mxu0 %v487_v27 }
  0x1d   :  { %458 = vmatpush3.bf16.msra.mxu1 %v496_v40 }
  0x1e   :  { %459 = vmatprep.subr.bf16.mxu1 %v497_v41 }
  0x1f   :  { %190 = vmatpush1.bf16.msra.mxu0 %v489_v30 }
  0x21   :  { %460 = vmatpush3.bf16.msra.mxu1 %v497_v41 }
  0x22   :  { %208 = vmatmul.mubr.bf16.vlgmr.msra.gmra.mxu0 %v409_v31 }
  0x23   :  { %217 = vmatprep.mubr.bf16.mxu0 %v498_v1 }
  0x2a   :  { %218 = vmatmul.mubr.bf16.gmra.mxu0 %v410_v36 }
  0xe2   :  { %v209_v42 = vpop.f32.mrf.mxu0 }
  0xe3   :  { %v255_v47 = vmul.f32 %v209_v42, %v209_v42 }
  0xe4   :  { %v211_v43 = vpop.f32.mrf.mxu0 }
  0xe5   :  { %v259_v45 = vmul.f32 %v211_v43, %v211_v43 }
  0xe6   :  { %v213_v44 = vpop.f32.mrf.mxu0 }
  0xe7   :  { %v256_v48 = vmul.f32 %v213_v44, %v213_v44  ;;  %v263_v51 = vadd.f32 %v259_v45, %v255_v47 }
  0xe8   :  { %v215_v46 = vpop.f32.mrf.mxu0 }
  0xe9   :  { %v260_v49 = vmul.f32 %v215_v46, %v215_v46 }
  0xea   :  { %v219_v50 = vpop.f32.mrf.mxu0 }
  0xeb   :  { %v264_v52 = vadd.f32 %v260_v49, %v256_v48  ;;  %v257_v58 = vmul.f32 %v219_v50, %v219_v50 }
  0xec   :  { %v221_v53 = vpop.f32.mrf.mxu0 }
  0xed   :  { %v267_v54 = vpack.c.bf16 %v264_v52, %v263_v51  ;;  %v261_v56 = vmul.f32 %v221_v53, %v221_v53 }
  0xee   :  { %v223_v55 = vpop.f32.mrf.mxu0 }
  0xef   :  { %461 = vmatprep.mubr.bf16.mxu1 %v267_v54  ;;  %v258_v59 = vmul.f32 %v223_v55, %v223_v55  ;;  %v265_v61 = vadd.f32 %v261_v56, %v257_v58 }
  0xf0   :  { %v225_v57 = vpop.f32.mrf.mxu0 }
  0xf1   :  { %v262_v60 = vmul.f32 %v225_v57, %v225_v57 }
  0xf3   :  { %v266_v62 = vadd.f32 %v262_v60, %v258_v59 }
  0xf5   :  { %v268_v63 = vpack.c.bf16 %v266_v62, %v265_v61 }
  0xf7   :  { %462 = vmatmul.mubr.bf16.vlgmr.msra.gmra.mxu1 %v268_v63 }
 0x1b7   :  { %v463_v0 = vpop.f32.mrf.mxu1 }
 0x1b8   :  { %402 = vst [vmem:[%s627_s4 + $0x10] sm:$0xff] %v463_v0 }
 0x1b9   :  { %v371_v1 = vpop.f32.mrf.mxu1 }
 0x1ba   :  { %400 = vst [vmem:[%s627_s4] sm:$0xff] %v371_v1 }
 0x1bb   :  { %v464_v2 = vpop.f32.mrf.mxu1 }
 0x1bc   :  { %403 = vst [vmem:[%s627_s4 + $0x18] sm:$0xff] %v464_v2 }
 0x1bd   :  { %v374_v3 = vpop.f32.mrf.mxu1 }
 0x1be   :  { %401 = vst [vmem:[%s627_s4 + $0x8] sm:$0xff] %v374_v3 }

</bundles_post_ra>
